<compile_context>
chip_gen: v6e
topology: v6e:2x2x1
jax: 0.10.0
libtpu: 0.0.40
codegen_flags: <defaults>
</compile_context>

<pallas_src>
import functools

import jax
import jax.numpy as jnp
from jax.experimental import pallas as pl
from jax.experimental.pallas import tpu as pltpu

LANE = 128
_VMEM_BUDGET_BYTES = 32 * 1024 * 1024  # conservative: fits every generation


def _round_up(n, m):
    return ((n + m - 1) // m) * m


def _pad_axis(a, axis, target):
    pad = target - a.shape[axis]
    if pad <= 0:
        return a
    widths = [(0, 0)] * a.ndim
    widths[axis] = (0, pad)
    return jnp.pad(a, widths)


def _choose_tm(B, d_in, in_bytes, out_bytes, block_batch):
    """Batch tile: big (amortize grid overhead), 16-row aligned (bf16 packing),
    >=2 grid steps when possible (v7x megacore), capped by a VMEM budget."""
    tm = _round_up(max((B + 1) // 2, 1), 16)
    tm = min(tm, _round_up(block_batch, 16))
    # Double-buffered x block + output block must fit the budget.
    while tm > 16 and 2 * tm * (d_in * in_bytes + LANE * out_bytes) > _VMEM_BUDGET_BYTES:
        tm = _round_up(tm // 2, 16)
    return max(tm, 16)


def _mlp_kernel(x_ref, w0_ref, b0_ref, w1_ref, b1_ref, w2_ref, b2_ref, o_ref,
                *, n_classes, compute_dtype):
    # Cast activations to the MXU compute dtype in-kernel (rides a spare VPU
    # slot) instead of a wrapper-side HBM round trip.
    x = x_ref[...].astype(compute_dtype)

    # dense0 + ReLU (MXU matmul, f32 accumulation)
    h0 = jnp.dot(x, w0_ref[...], preferred_element_type=jnp.float32) + b0_ref[...]
    h0 = jnp.maximum(h0, 0.0)

    # Dropout(p=0.5): identity in eval/inference mode.
    # TODO(synk): training-mode dropout (pltpu.prng_random_bits mask + 1/(1-p)).

    # dense1 + ReLU
    h1 = jnp.dot(h0.astype(compute_dtype), w1_ref[...],
                 preferred_element_type=jnp.float32) + b1_ref[...]
    h1 = jnp.maximum(h1, 0.0)

    # output layer: class dim is zero-padded to a 128-lane slab. Padded logits
    # are exactly 0 (zero-padded weights/bias, finite), so the row max is safe;
    # their exp contribution is zeroed out of the denominator below.
    logits = jnp.dot(h1.astype(compute_dtype), w2_ref[...],
                     preferred_element_type=jnp.float32) + b2_ref[...]

    m = jnp.max(logits, axis=-1, keepdims=True)
    e = jnp.exp(logits - m)
    lane_id = jax.lax.broadcasted_iota(jnp.int32, e.shape, 1)
    e = jnp.where(lane_id < n_classes, e, 0.0)
    denom = jnp.sum(e, axis=-1, keepdims=True)
    o_ref[...] = (e * pl.reciprocal(denom, approx=True)).astype(o_ref.dtype)


def prepare_params(w0, b0, w1, b1, w2, b2, *, use_bf16=True):
    """Pad + cast weights once (hoisted out of the per-call path)."""
    hid0, hid1, n_cls = w0.shape[1], w1.shape[1], w2.shape[1]
    hid0_p, hid1_p, cls_p = (_round_up(n, LANE) for n in (hid0, hid1, n_cls))
    cdt = jnp.bfloat16 if use_bf16 else jnp.float32

    w0p = _pad_axis(w0, 1, hid0_p).astype(cdt)
    b0p = _pad_axis(b0.reshape(1, -1), 1, hid0_p).astype(jnp.float32)
    w1p = _pad_axis(_pad_axis(w1, 0, hid0_p), 1, hid1_p).astype(cdt)
    b1p = _pad_axis(b1.reshape(1, -1), 1, hid1_p).astype(jnp.float32)
    w2p = _pad_axis(_pad_axis(w2, 0, hid1_p), 1, cls_p).astype(cdt)
    b2p = _pad_axis(b2.reshape(1, -1), 1, cls_p).astype(jnp.float32)

    return {
        "weights": (w0p, b0p, w1p, b1p, w2p, b2p),
        "n_classes": n_cls,
        "cls_p": cls_p,
        "compute_dtype": cdt,
    }


def mlp_forward(x, prepared, *, block_batch=4096, out_dtype=jnp.bfloat16,
                training=False):
    """Whole MLP in one Pallas program; batch blocked, weights VMEM-resident."""
    if training:
        # TODO(synk): training-mode dropout not implemented in the kernel.
        raise NotImplementedError("training-mode dropout is not implemented")

    B, d_in = x.shape
    w0p, b0p, w1p, b1p, w2p, b2p = prepared["weights"]
    assert w0p.shape[0] == d_in, (w0p.shape, d_in)
    n_cls, cls_p = prepared["n_classes"], prepared["cls_p"]

    out_bytes = jnp.dtype(out_dtype).itemsize
    tm = _choose_tm(B, d_in, x.dtype.itemsize, out_bytes, block_batch)
    b_pad = _round_up(B, tm)
    xk = _pad_axis(x, 0, b_pad)
    grid = (b_pad // tm,)

    kernel = functools.partial(_mlp_kernel, n_classes=n_cls,
                               compute_dtype=prepared["compute_dtype"])

    out_padded = pl.pallas_call(
        kernel,
        out_shape=jax.ShapeDtypeStruct((b_pad, cls_p), out_dtype),
        grid=grid,
        in_specs=[
            pl.BlockSpec((tm, d_in), lambda i: (i, 0)),
            pl.BlockSpec(w0p.shape, lambda i: (0, 0)),
            pl.BlockSpec(b0p.shape, lambda i: (0, 0)),
            pl.BlockSpec(w1p.shape, lambda i: (0, 0)),
            pl.BlockSpec(b1p.shape, lambda i: (0, 0)),
            pl.BlockSpec(w2p.shape, lambda i: (0, 0)),
            pl.BlockSpec(b2p.shape, lambda i: (0, 0)),
        ],
        out_specs=pl.BlockSpec((tm, cls_p), lambda i: (i, 0)),
        compiler_params=pltpu.CompilerParams(
            dimension_semantics=("parallel",),
            vmem_limit_bytes=48 * 1024 * 1024),
    )(xk, w0p, b0p, w1p, b1p, w2p, b2p)

    # Lane-dense (B_pad, 128) slab -> real (B, n_cls) probabilities (f32 API).
    return out_padded[:B, :n_cls].astype(jnp.float32)


def init_params(key, input_dim, hid_size=100):
    """Deterministic PyTorch-Linear-style init (uniform +/- 1/sqrt(fan_in))."""
    def linear_init(k, fan_in, fan_out):
        k_w, k_b = jax.random.split(k)
        bound = 1.0 / jnp.sqrt(fan_in)
        w = jax.random.uniform(k_w, (fan_in, fan_out), jnp.float32, -bound, bound)
        b = jax.random.uniform(k_b, (1, fan_out), jnp.float32, -bound, bound)
        return w, b

    k0, k1, k2 = jax.random.split(key, 3)
    w0, b0 = linear_init(k0, input_dim, hid_size)
    w1, b1 = linear_init(k1, hid_size, 10)
    w2, b2 = linear_init(k2, 10, 2)
    return w0, b0, w1, b1, w2, b2


def reference_forward(x, w0, b0, w1, b1, w2, b2, compute_dtype=jnp.float32):
    c = compute_dtype
    h0 = jnp.maximum(
        jnp.dot(x.astype(c), w0.astype(c), preferred_element_type=jnp.float32) + b0, 0.0)
    h1 = jnp.maximum(
        jnp.dot(h0.astype(c), w1.astype(c), preferred_element_type=jnp.float32) + b1, 0.0)
    logits = jnp.dot(h1.astype(c), w2.astype(c),
                     preferred_element_type=jnp.float32) + b2
    return jax.nn.softmax(logits, axis=-1)


if __name__ == "__main__":
    key = jax.random.PRNGKey(0)
    k_x, k_p = jax.random.split(key)

    batch, input_dim, hid_size = 8, 32, 100
    x = jax.random.normal(k_x, (batch, input_dim), jnp.float32)
    params = init_params(k_p, input_dim, hid_size)

    prepared = prepare_params(*params)          # pad + cast weights once
    out = mlp_forward(x, prepared)
    out = jax.block_until_ready(out)
    assert out.shape == (batch, 2), out.shape

    # Probabilities must sum to 1 per row.
    assert jnp.allclose(out.sum(-1), 1.0, atol=1e-2), "rows do not sum to 1"

    # Check against a reference using the same bf16-input / f32-accumulate
    # matmul pipeline the kernel runs (kernel additionally rounds to bf16 and
    # uses an approx reciprocal -> modest tolerance).
    ref_matched = reference_forward(x, *params, compute_dtype=jnp.bfloat16)
    assert jnp.allclose(out, ref_matched, atol=1e-2, rtol=0.0), \
        "mismatch vs matched-precision reference"

    # Sanity check against the pure-f32 PyTorch-equivalent forward.
    ref_f32 = reference_forward(x, *params)
    assert jnp.allclose(out, ref_f32, atol=3e-2, rtol=0.0), \
        "mismatch vs f32 reference"

    print("KERNEL_OK")
</pallas_src>

<mosaic_0001>
module attributes {stable_mosaic.version = 11 : i64} {
  func.func @_mlp_kernel(%arg0: i32, %arg1: memref<16x32xf32, #tpu.memory_space<vmem>>, %arg2: memref<32x128xbf16, #tpu.memory_space<vmem>>, %arg3: memref<1x128xf32, #tpu.memory_space<vmem>>, %arg4: memref<128x128xbf16, #tpu.memory_space<vmem>>, %arg5: memref<1x128xf32, #tpu.memory_space<vmem>>, %arg6: memref<128x128xbf16, #tpu.memory_space<vmem>>, %arg7: memref<1x128xf32, #tpu.memory_space<vmem>>, %arg8: memref<16x128xbf16, #tpu.memory_space<vmem>>) attributes {dimension_semantics = [#tpu.dimension_semantics<parallel>], iteration_bounds = array<i64: 1>, scalar_prefetch = 0 : i64, scratch_operands = 0 : i64, tpu.core_type = #tpu.core_type<tc>, window_params = [{transform_indices = @transform_0, window_bounds = array<i64: 16, 32>}, {pipeline_mode = #tpu.pipeline_mode<synchronous>, transform_indices = @transform_1, window_bounds = array<i64: 32, 128>}, {pipeline_mode = #tpu.pipeline_mode<synchronous>, transform_indices = @transform_2, window_bounds = array<i64: 1, 128>}, {pipeline_mode = #tpu.pipeline_mode<synchronous>, transform_indices = @transform_3, window_bounds = array<i64: 128, 128>}, {pipeline_mode = #tpu.pipeline_mode<synchronous>, transform_indices = @transform_4, window_bounds = array<i64: 1, 128>}, {pipeline_mode = #tpu.pipeline_mode<synchronous>, transform_indices = @transform_5, window_bounds = array<i64: 128, 128>}, {pipeline_mode = #tpu.pipeline_mode<synchronous>, transform_indices = @transform_6, window_bounds = array<i64: 1, 128>}, {transform_indices = @transform_7, window_bounds = array<i64: 16, 128>}]} {
    %c0 = arith.constant 0 : index
    %c0_0 = arith.constant 0 : index
    %0 = vector.load %arg1[%c0, %c0_0] : memref<16x32xf32, #tpu.memory_space<vmem>>, vector<16x32xf32>
    %1 = arith.truncf %0 : vector<16x32xf32> to vector<16x32xbf16>
    %c0_1 = arith.constant 0 : index
    %c0_2 = arith.constant 0 : index
    %2 = vector.load %arg2[%c0_1, %c0_2] : memref<32x128xbf16, #tpu.memory_space<vmem>>, vector<32x128xbf16>
    %cst = arith.constant dense<0.000000e+00> : vector<16x128xf32>
    %3 = tpu.matmul %1, %2, %cst {dimension_numbers = #tpu.dot_dimension_numbers<[1], [0], [0], [1], [0, 0, 1, 1], [], []>} : vector<16x32xbf16>, vector<32x128xbf16>, vector<16x128xf32> -> vector<16x128xf32>
    %c0_3 = arith.constant 0 : index
    %c0_4 = arith.constant 0 : index
    %4 = vector.load %arg3[%c0_3, %c0_4] : memref<1x128xf32, #tpu.memory_space<vmem>>, vector<1x128xf32>
    %5 = vector.broadcast %4 : vector<1x128xf32> to vector<16x128xf32>
    %6 = arith.addf %3, %5 : vector<16x128xf32>
    %cst_5 = arith.constant 0.000000e+00 : f32
    %7 = vector.broadcast %cst_5 : f32 to vector<16x128xf32>
    %8 = arith.maximumf %6, %7 : vector<16x128xf32>
    %9 = arith.truncf %8 : vector<16x128xf32> to vector<16x128xbf16>
    %c0_6 = arith.constant 0 : index
    %c0_7 = arith.constant 0 : index
    %10 = vector.load %arg4[%c0_6, %c0_7] : memref<128x128xbf16, #tpu.memory_space<vmem>>, vector<128x128xbf16>
    %cst_8 = arith.constant dense<0.000000e+00> : vector<16x128xf32>
    %11 = tpu.matmul %9, %10, %cst_8 {dimension_numbers = #tpu.dot_dimension_numbers<[1], [0], [0], [1], [0, 0, 1, 1], [], []>} : vector<16x128xbf16>, vector<128x128xbf16>, vector<16x128xf32> -> vector<16x128xf32>
    %c0_9 = arith.constant 0 : index
    %c0_10 = arith.constant 0 : index
    %12 = vector.load %arg5[%c0_9, %c0_10] : memref<1x128xf32, #tpu.memory_space<vmem>>, vector<1x128xf32>
    %13 = vector.broadcast %12 : vector<1x128xf32> to vector<16x128xf32>
    %14 = arith.addf %11, %13 : vector<16x128xf32>
    %cst_11 = arith.constant 0.000000e+00 : f32
    %15 = vector.broadcast %cst_11 : f32 to vector<16x128xf32>
    %16 = arith.maximumf %14, %15 : vector<16x128xf32>
    %17 = arith.truncf %16 : vector<16x128xf32> to vector<16x128xbf16>
    %c0_12 = arith.constant 0 : index
    %c0_13 = arith.constant 0 : index
    %18 = vector.load %arg6[%c0_12, %c0_13] : memref<128x128xbf16, #tpu.memory_space<vmem>>, vector<128x128xbf16>
    %cst_14 = arith.constant dense<0.000000e+00> : vector<16x128xf32>
    %19 = tpu.matmul %17, %18, %cst_14 {dimension_numbers = #tpu.dot_dimension_numbers<[1], [0], [0], [1], [0, 0, 1, 1], [], []>} : vector<16x128xbf16>, vector<128x128xbf16>, vector<16x128xf32> -> vector<16x128xf32>
    %c0_15 = arith.constant 0 : index
    %c0_16 = arith.constant 0 : index
    %20 = vector.load %arg7[%c0_15, %c0_16] : memref<1x128xf32, #tpu.memory_space<vmem>>, vector<1x128xf32>
    %21 = vector.broadcast %20 : vector<1x128xf32> to vector<16x128xf32>
    %22 = arith.addf %19, %21 : vector<16x128xf32>
    %cst_17 = arith.constant dense<0xFF800000> : vector<16xf32>
    %23 = vector.multi_reduction <maximumf>, %22, %cst_17 [1] : vector<16x128xf32> to vector<16xf32>
    %24 = vector.shape_cast %23 : vector<16xf32> to vector<16x1xf32>
    %25 = vector.broadcast %24 : vector<16x1xf32> to vector<16x128xf32>
    %26 = arith.subf %22, %25 : vector<16x128xf32>
    %27 = math.exp %26 : vector<16x128xf32>
    %28 = tpu.iota {dimensions = array<i32: 1>} : vector<16x128xi32>
    %c2_i32 = arith.constant 2 : i32
    %29 = vector.broadcast %c2_i32 : i32 to vector<16x128xi32>
    %30 = arith.cmpi slt, %28, %29 : vector<16x128xi32>
    %cst_18 = arith.constant 0.000000e+00 : f32
    %31 = vector.broadcast %cst_18 : f32 to vector<16x128xf32>
    %32 = arith.select %30, %27, %31 : vector<16x128xi1>, vector<16x128xf32>
    %cst_19 = arith.constant dense<0.000000e+00> : vector<16xf32>
    %33 = vector.multi_reduction <add>, %32, %cst_19 [1] : vector<16x128xf32> to vector<16xf32>
    %34 = vector.shape_cast %33 : vector<16xf32> to vector<16x1xf32>
    %35 = tpu.reciprocal %34 {approx = true} : vector<16x1xf32> -> vector<16x1xf32>
    %36 = vector.broadcast %35 : vector<16x1xf32> to vector<16x128xf32>
    %37 = arith.mulf %32, %36 : vector<16x128xf32>
    %38 = arith.truncf %37 : vector<16x128xf32> to vector<16x128xbf16>
    %c0_20 = arith.constant 0 : index
    %c0_21 = arith.constant 0 : index
    %39 = vector.load %arg8[%c0_20, %c0_21] : memref<16x128xbf16, #tpu.memory_space<vmem>>, vector<16x128xbf16>
    tpu.vector_store %arg8[%c0_20, %c0_21], %38 {strides = array<i32>} : memref<16x128xbf16, #tpu.memory_space<vmem>>, vector<16x128xbf16>,
    return
  }
  func.func @transform_0(%arg0: i32) -> (i32, i32) {
    %c0_i32 = arith.constant 0 : i32
    %c0_i32_0 = arith.constant 0 : i32
    return %arg0, %c0_i32 : i32, i32
  }
  func.func @transform_1(%arg0: i32) -> (i32, i32) {
    %c0_i32 = arith.constant 0 : i32
    %c0_i32_0 = arith.constant 0 : i32
    %c0_i32_1 = arith.constant 0 : i32
    return %c0_i32, %c0_i32_0 : i32, i32
  }
  func.func @transform_2(%arg0: i32) -> (i32, i32) {
    %c0_i32 = arith.constant 0 : i32
    %c0_i32_0 = arith.constant 0 : i32
    %c0_i32_1 = arith.constant 0 : i32
    return %c0_i32, %c0_i32_0 : i32, i32
  }
  func.func @transform_3(%arg0: i32) -> (i32, i32) {
    %c0_i32 = arith.constant 0 : i32
    %c0_i32_0 = arith.constant 0 : i32
    %c0_i32_1 = arith.constant 0 : i32
    return %c0_i32, %c0_i32_0 : i32, i32
  }
  func.func @transform_4(%arg0: i32) -> (i32, i32) {
    %c0_i32 = arith.constant 0 : i32
    %c0_i32_0 = arith.constant 0 : i32
    %c0_i32_1 = arith.constant 0 : i32
    return %c0_i32, %c0_i32_0 : i32, i32
  }
  func.func @transform_5(%arg0: i32) -> (i32, i32) {
    %c0_i32 = arith.constant 0 : i32
    %c0_i32_0 = arith.constant 0 : i32
    %c0_i32_1 = arith.constant 0 : i32
    return %c0_i32, %c0_i32_0 : i32, i32
  }
  func.func @transform_6(%arg0: i32) -> (i32, i32) {
    %c0_i32 = arith.constant 0 : i32
    %c0_i32_0 = arith.constant 0 : i32
    %c0_i32_1 = arith.constant 0 : i32
    return %c0_i32, %c0_i32_0 : i32, i32
  }
  func.func @transform_7(%arg0: i32) -> (i32, i32) {
    %c0_i32 = arith.constant 0 : i32
    %c0_i32_0 = arith.constant 0 : i32
    return %arg0, %c0_i32 : i32, i32
  }
}

</mosaic_0001>

<bundles_post_ra>
// kernel: tpu_custom_call.1
= control target key start
LH: loop header
LB: loop body
LE: loop exit
PB: predicated region body
PF: predicated region fallthrough
CT: control target
= control target key end

     0   :  { %12 = vsyncpa [#allocation3], 0  ;;  %s792_s0 = inlined_call_operand.hbm [shape: f32[16,32], index: 0, kind: input, shape index: {}]   ;;  %s793_s1 = inlined_call_operand.hbm [shape: bf16[32,128], index: 1, kind: input, shape index: {}]   ;;  %s794_s2 = inlined_call_operand.vmem [shape: f32[1,128], index: 2, kind: input, shape index: {}]   ;;  %s795_s3 = inlined_call_operand.hbm [shape: bf16[128,128], index: 3, kind: input, shape index: {}]   ;;  %s796_s4 = inlined_call_operand.vmem [shape: f32[1,128], index: 4, kind: input, shape index: {}]   ;;  %s797_s5 = inlined_call_operand.hbm [shape: bf16[128,128], index: 5, kind: input, shape index: {}]   ;;  %s798_s6 = inlined_call_operand.vmem [shape: f32[1,128], index: 6, kind: input, shape index: {}]   ;;  %s799_s7 = inlined_call_operand.hbm [shape: bf16[16,128], index: 7, kind: output, shape index: {}]  }
   0x1   :  { %13 = vsyncpa [#allocation6], 0 }
   0x2   :  { %14 = vsyncpa [#allocation9], 0 }
   0x3   :  { %15 = vsyncpa [#allocation4], 0  ;;  %s681_s24 = smov [#allocation5]  }
   0x4   :  { %s33_s25 = sshll.u32 %s681_s24, 4  ;;  %s34_s25 = int_to_ptr.vmem [resolvable:$true] %s33_s25 }
   0x5   :  { %s581_s26 = scalar_lea.vmem %s34_s25, 256  ;;  %p586_p1 = scmp.lt.s32.totalorder %s34_s25, %s34_s25 }
   0x6   :  { %p582_p0 = scmp.ne.s32.totalorder %s34_s25, %s581_s26  ;;  %p587_p2 = scmp.lt.s32.totalorder %s581_s26, %s581_s26 }
   0x8   :  { %p588_p3 = por %p587_p2, %p586_p1 }
   0xa   :  { %p589_p4 = pnand %p588_p3, %p582_p0 }
   0xc   :  { %592 = shalt.err (!%p589_p4)
}
   0xd   :  { %s682_s27 = smov 64   ;;  %s683_s28 = smov 4  }
   0xe   :  { %39 = dma.hbm_to_vmem [thread:$0]  %s793_s1, 256, %s34_s25, [#allocation6], %s682_s27, %s682_s27, %s683_s28  }
   0xf   :  { %s684_s8 = smov [#allocation2]  }
  0x10   :  { %s21_s9 = sshll.u32 %s684_s8, 4  ;;  %s22_s9 = int_to_ptr.vmem [resolvable:$true] %s21_s9 }
  0x11   :  { %s601_s10 = scalar_lea.vmem %s22_s9, 256  ;;  %p606_p6 = scmp.lt.s32.totalorder %s22_s9, %s22_s9 }
  0x12   :  { %p602_p5 = scmp.ne.s32.totalorder %s22_s9, %s601_s10  ;;  %p607_p7 = scmp.lt.s32.totalorder %s601_s10, %s601_s10 }
  0x14   :  { %p608_p8 = por %p607_p7, %p606_p6 }
  0x16   :  { %p609_p9 = pnand %p608_p8, %p602_p5 }
  0x18   :  { %612 = shalt.err (!%p609_p9)
}
  0x19   :  { %s685_s11 = smov 128   ;;  %s686_s12 = smov 8  }
  0x1a   :  { %27 = dma.hbm_to_vmem [thread:$0]  %s792_s0, 256, %s22_s9, [#allocation3], %s685_s11, %s685_s11, %s686_s12  }
  0x1b   :  { %s687_s15 = smov [#allocation7]   ;;  %s688_s17 = smov [#allocation8]  }
  0x1c   :  { %s47_s16 = sshll.u32 %s687_s15, 4  ;;  %s61_s1 = sshll.u32 %s688_s17, 4  ;;  %s48_s16 = int_to_ptr.vmem [resolvable:$true] %s47_s16  ;;  %s62_s1 = int_to_ptr.vmem [resolvable:$true] %s61_s1 }
  0x1d   :  { %s621_s18 = scalar_lea.vmem %s48_s16, 1024  ;;  %p626_p11 = scmp.lt.s32.totalorder %s48_s16, %s48_s16 }
  0x1e   :  { %p622_p10 = scmp.ne.s32.totalorder %s48_s16, %s621_s18  ;;  %p627_p12 = scmp.lt.s32.totalorder %s621_s18, %s621_s18 }
  0x20   :  { %p628_p13 = por %p627_p12, %p626_p11 }
  0x22   :  { %p629_p0 = pnand %p628_p13, %p622_p10 }
  0x24   :  { %632 = shalt.err (!%p629_p0)
}
  0x25   :  { %53 = dma.hbm_to_vmem [thread:$0]  %s795_s3, 1024, %s48_s16, [#allocation6], %s682_s27, %s682_s27, %s683_s28  }
  0x26   :  { %s641_s0 = scalar_lea.vmem %s62_s1, 1024  ;;  %p646_p2 = scmp.lt.s32.totalorder %s62_s1, %s62_s1 }
  0x27   :  { %p642_p1 = scmp.ne.s32.totalorder %s62_s1, %s641_s0  ;;  %p647_p3 = scmp.lt.s32.totalorder %s641_s0, %s641_s0 }
  0x29   :  { %p648_p4 = por %p647_p3, %p646_p2 }
  0x2b   :  { %p649_p5 = pnand %p648_p4, %p642_p1 }
  0x2d   :  { %652 = shalt.err (!%p649_p5)
}
  0x2e   :  { %67 = dma.hbm_to_vmem [thread:$0]  %s797_s5, 1024, %s62_s1, [#allocation9], %s682_s27, %s682_s27, %s683_s28  }
  0x2f   :  { %673 = dma.done.wait [#allocation3], 256  }
  0x30   :  { %674 = vsyncadd [#allocation3], 4294967040 }
  0x31   :  { %675 = dma.done.wait [#allocation6], 1280  }
  0x32   :  { %676 = vsyncadd [#allocation6], 4294966016 }
  0x33   :  { %677 = dma.done.wait [#allocation9], 1024  }
  0x34   :  { %678 = vsyncadd [#allocation9], 4294966272  ;;  %v689_v0 = vmov 0.0   ;;  %vm690_vm0 = vmmov 0   ;;  %v547_v1 = vld [vmem:[#allocation5 + $0x8] sm:$0xff]   ;;  %v548_v2 = vld [vmem:[#allocation5] sm:$0xff]   ;;  %v394_v55 = vlaneseq }
  0x35   :  { %488 = vmatprep.subr.bf16.mxu0 %v689_v0  ;;  %492 = vmatprep.mubr.msk.bf16.mxu0 %vm690_vm0, %v689_v0  ;;  %v83_v3 = vld [vmem:[#allocation2] sm:$0xff]  ;;  %v84_v4 = vld [vmem:[#allocation2 + $0x8] sm:$0xff]  ;;  %v549_v5 = vld [vmem:[#allocation7 + $0x38] sm:$0xff]   ;;  %vm109_vm1 = vcmask 261120  }
  0x36   :  { %496 = vmatprep.subr.bf16.mxu1 %v689_v0  ;;  %512 = vmatprep.mubr.msk.bf16.mxu1 %vm690_vm0, %v689_v0  ;;  %v85_v6 = vpack.c.bf16 %v84_v4, %v83_v3  ;;  %v550_v7 = vld [vmem:[#allocation7 + $0x30] sm:$0xff]   ;;  %v551_v8 = vld [vmem:[#allocation7 + $0x28] sm:$0xff]   ;;  %v552_v9 = vld [vmem:[#allocation7 + $0x20] sm:$0xff]   ;;  %v395_v56 = vand.u32 127, %v394_v55 }
  0x37   :  { %489 = vmatpush3.bf16.msra.mxu0 %v547_v1  ;;  %497 = vmatpush3.bf16.msra.mxu1 %v549_v5  ;;  %v553_v10 = vld [vmem:[#allocation7 + $0x18] sm:$0xff]   ;;  %v554_v11 = vld [vmem:[#allocation7 + $0x10] sm:$0xff]   ;;  %v555_v12 = vld [vmem:[#allocation7 + $0x8] sm:$0xff]  }
  0x38   :  { %490 = vmatprep.subr.bf16.mxu0 %v689_v0  ;;  %498 = vmatprep.subr.bf16.mxu1 %v689_v0  ;;  %v556_v13 = vld [vmem:[#allocation7] sm:$0xff]   ;;  %v557_v14 = vld [vmem:[#allocation8 + $0x38] sm:$0xff]   ;;  %v558_v15 = vld [vmem:[#allocation8 + $0x30] sm:$0xff]   ;;  %vm396_vm2 = vcmp.lt.s32.totalorder %v395_v56, 2 }
  0x39   :  { %v559_v16 = vld [vmem:[#allocation8 + $0x28] sm:$0xff]   ;;  %v560_v17 = vld [vmem:[#allocation8 + $0x20] sm:$0xff]   ;;  %v561_v18 = vld [vmem:[#allocation8 + $0x18] sm:$0xff]  }
  0x3a   :  { %v436_v19 = vld [vmem:[%s794_s2] ss:$0 sm:$0xff]  ;;  %v562_v29 = vld [vmem:[#allocation8 + $0x10] sm:$0xff]   ;;  %v563_v30 = vld [vmem:[#allocation8 + $0x8] sm:$0xff]  }
  0x3b   :  { %491 = vmatpush3.bf16.msra.mxu0 %v548_v2  ;;  %499 = vmatpush3.bf16.msra.mxu1 %v550_v7  ;;  %v564_v31 = vld [vmem:[#allocation8] sm:$0xff]  }
  0x3c   :  { %516 = vmatprep.subr.bf16.mxu0 %v689_v0  ;;  %500 = vmatprep.subr.bf16.mxu1 %v689_v0  ;;  %v440_v32 = vld [vmem:[%s796_s4] ss:$0 sm:$0xff]  ;;  %s691_s4 = smov [#allocation10]  }
  0x3d   :  { %v449_v42 = vld [vmem:[%s798_s6] ss:$0 sm:$0xff]  ;;  %s422_s6 = sshll.u32 %s691_s4, 4  ;;  %s423_s6 = int_to_ptr.vmem [resolvable:$true] %s422_s6 }
  0x3e   :  { %493 = vmatmul.mubr.msk.bf16.vlgmr.msra.gmra.mxu0 %vm109_vm1, %v85_v6  ;;  %s653_s26 = scalar_lea.vmem %s423_s6, 128  ;;  %p658_p7 = scmp.lt.s32.totalorder %s423_s6, %s423_s6 }
  0x3f   :  { %532 = vmatprep.mubr.msk.bf16.mxu0 %vm690_vm0, %v689_v0  ;;  %501 = vmatpush3.bf16.msra.mxu1 %v551_v8  ;;  %p654_p6 = scmp.ne.s32.totalorder %s423_s6, %s653_s26  ;;  %p659_p8 = scmp.lt.s32.totalorder %s653_s26, %s653_s26 }
  0x40   :  { %502 = vmatprep.subr.bf16.mxu1 %v689_v0  ;;  %517 = vmatpush3.bf16.msra.mxu0 %v557_v14 }
  0x41   :  { %518 = vmatprep.subr.bf16.mxu0 %v689_v0  ;;  %p660_p9 = por %p659_p8, %p658_p7 }
  0x43   :  { %503 = vmatpush3.bf16.msra.mxu1 %v552_v9  ;;  %p661_p10 = pnand %p660_p9, %p654_p6 }
  0x44   :  { %504 = vmatprep.subr.bf16.mxu1 %v689_v0  ;;  %519 = vmatpush3.bf16.msra.mxu0 %v558_v15 }
  0x45   :  { %520 = vmatprep.subr.bf16.mxu0 %v689_v0 }
  0x47   :  { %505 = vmatpush3.bf16.msra.mxu1 %v553_v10 }
  0x48   :  { %506 = vmatprep.subr.bf16.mxu1 %v689_v0  ;;  %521 = vmatpush3.bf16.msra.mxu0 %v559_v16 }
  0x49   :  { %522 = vmatprep.subr.bf16.mxu0 %v689_v0 }
  0x4b   :  { %507 = vmatpush3.bf16.msra.mxu1 %v554_v11 }
  0x4c   :  { %508 = vmatprep.subr.bf16.mxu1 %v689_v0  ;;  %523 = vmatpush3.bf16.msra.mxu0 %v560_v17 }
  0x4d   :  { %524 = vmatprep.subr.bf16.mxu0 %v689_v0 }
  0x4f   :  { %509 = vmatpush3.bf16.msra.mxu1 %v555_v12 }
  0x50   :  { %510 = vmatprep.subr.bf16.mxu1 %v689_v0  ;;  %525 = vmatpush3.bf16.msra.mxu0 %v561_v18 }
  0x51   :  { %526 = vmatprep.subr.bf16.mxu0 %v689_v0 }
  0x53   :  { %511 = vmatpush3.bf16.msra.mxu1 %v556_v13 }
  0x54   :  { %527 = vmatpush3.bf16.msra.mxu0 %v562_v29 }
  0x55   :  { %528 = vmatprep.subr.bf16.mxu0 %v689_v0 }
  0x58   :  { %529 = vmatpush3.bf16.msra.mxu0 %v563_v30 }
  0x59   :  { %530 = vmatprep.subr.bf16.mxu0 %v689_v0 }
  0x5c   :  { %531 = vmatpush3.bf16.msra.mxu0 %v564_v31 }
  0xfe   :  { %v147_v20 = vpop.f32.mrf.mxu0 }
  0xff   :  { %v148_v22 = vadd.f32 %v436_v19, %v147_v20 }
 0x100   :  { %v494_v21 = vpop.f32.mrf.mxu0 }
 0x101   :  { %v154_v26 = vmax.f32 %v148_v22, 0.0 }
 0x102   :  { %v150_v23 = vpop.f32.mrf.mxu0 }
 0x103   :  { %v151_v24 = vadd.f32 %v436_v19, %v150_v23 }
 0x104   :  { %v495_v25 = vpop.f32.mrf.mxu0 }
 0x105   :  { %v155_v27 = vmax.f32 %v151_v24, 0.0 }
 0x107   :  { %v156_v28 = vpack.c.bf16 %v155_v27, %v154_v26 }
 0x109   :  { %513 = vmatmul.mubr.bf16.vlgmr.msra.gmra.mxu1 %v156_v28 }
 0x1c9   :  { %v262_v33 = vpop.f32.mrf.mxu1 }
 0x1ca   :  { %v263_v35 = vadd.f32 %v440_v32, %v262_v33 }
 0x1cb   :  { %v514_v34 = vpop.f32.mrf.mxu1 }
 0x1cc   :  { %v269_v39 = vmax.f32 %v263_v35, 0.0 }
 0x1cd   :  { %v265_v36 = vpop.f32.mrf.mxu1 }
 0x1ce   :  { %v266_v37 = vadd.f32 %v440_v32, %v265_v36 }
 0x1cf   :  { %v515_v38 = vpop.f32.mrf.mxu1 }
 0x1d0   :  { %v270_v40 = vmax.f32 %v266_v37, 0.0 }
 0x1d2   :  { %v271_v41 = vpack.c.bf16 %v270_v40, %v269_v39 }
 0x1d4   :  { %533 = vmatmul.mubr.bf16.vlgmr.msra.gmra.mxu0 %v271_v41 }
 0x294   :  { %v377_v43 = vpop.f32.mrf.mxu0 }
 0x295   :  { %v378_v44 = vadd.f32 %v449_v42, %v377_v43 }
 0x296   :  { %v534_v45 = vpop.f32.mrf.mxu0 }
 0x297   :  { %384 = vmax.xlane.f32.xlu0 %v378_v44 }
 0x298   :  { %v380_v46 = vpop.f32.mrf.mxu0 }
 0x299   :  { %v381_v47 = vadd.f32 %v449_v42, %v380_v46 }
 0x29a   :  { %v535_v48 = vpop.f32.mrf.mxu0 }
 0x29b   :  { %386 = vmax.xlane.f32.xlu0 %v381_v47 }
 0x320   :  { %v385_v49 = vpop.xlane.xlu0 %384 }
 0x321   :  { %v388_v50 = vsub.f32 %v378_v44, %v385_v49 }
 0x323   :  { %v390_v51 = vmul.f32 1.442695, %v388_v50 }
 0x324   :  { %v387_v52 = vpop.xlane.xlu0 %386 }
 0x325   :  { %565 = vpow2.f32 %v390_v51  ;;  %v389_v53 = vsub.f32 %v381_v47, %v387_v52 }
 0x327   :  { %v392_v54 = vmul.f32 1.442695, %v389_v53 }
 0x329   :  { %567 = vpow2.f32 %v392_v54 }
 0x332   :  { %v566_v57 = vpop.eup %565 }
 0x333   :  { %v397_v58 = vsel %vm396_vm2, %v566_v57, 0.0 }
 0x334   :  { %399 = vadd.xlane.f32.xlu1 %v397_v58 }
 0x336   :  { %v568_v59 = vpop.eup %567 }
 0x337   :  { %v398_v60 = vsel %vm396_vm2, %v568_v59, 0.0 }
 0x338   :  { %401 = vadd.xlane.f32.xlu1 %v398_v60 }
 0x3bd   :  { %v400_v61 = vpop.xlane.xlu1 %399 }
 0x3be   :  { %569 = vrcp.f32 %v400_v61 }
 0x3c1   :  { %v402_v62 = vpop.xlane.xlu1 %401 }
 0x3c2   :  { %571 = vrcp.f32 %v402_v62 }
 0x3cb   :  { %v570_v63 = vpop.eup %569 }
 0x3cc   :  { %v405_v1 = vmul.f32 %v570_v63, %v397_v58 }
 0x3cf   :  { %v572_v0 = vpop.eup %571 }
 0x3d0   :  { %v406_v2 = vmul.f32 %v572_v0, %v398_v60 }
 0x3d2   :  { %v465_v3 = vpack.c.bf16 %v406_v2, %v405_v1 }
 0x3d4   :  { %466 = vst [vmem:[#allocation10] sm:$0xff] %v465_v3  }
 0x3d5   :  { %664 = shalt.err (!%p661_p10)
}
 0x3d6   :  { %428 = dma.vmem_to_hbm [thread:$0]  %s423_s6, 128, %s799_s7, [#allocation4], %s682_s27, %s682_s27, %s683_s28  }
 0x3d7   :  { %679 = dma.done.wait [#allocation4], 128  }
 0x3d8   :  { %680 = vsyncadd [#allocation4], 4294967168 }
 0x3d9   :  { %432 = vsyncpa [#allocation3], 1 }
 0x3da   :  { %433 = vsyncpa [#allocation6], 1 }
 0x3db   :  { %434 = vsyncpa [#allocation9], 1 }
 0x3dc   :  { %435 = vsyncpa [#allocation4], 1 }

</bundles_post_ra>
